<compile_context>
chip_gen: v7x
topology: tpu7x:2x2x1
jax: 0.10.0
libtpu: 0.0.40
codegen_flags: <defaults>
</compile_context>

<pallas_src>
import functools

import jax
import jax.numpy as jnp
from jax.experimental import pallas as pl
from jax.experimental.pallas import tpu as pltpu

_HALF = jnp.bfloat16          # TPU half-precision stand-in for torch .half()
_VMEM_BUDGET = 32 << 20       # conservative working-set budget for tile sizing
_VMEM_LIMIT = 48 * 1024 * 1024


def _round_up(x, m):
    return (x + m - 1) // m * m


# --------------------------------------------------------------------------
# Kernel 1: row (last-dim) L2-normalize     -- cache_keys path
# --------------------------------------------------------------------------
def _rownorm_kernel(x_ref, o_ref):
    x = x_ref[...].astype(jnp.float32)
    inv = jax.lax.rsqrt(jnp.sum(x * x, axis=-1, keepdims=True))   # EUP rsqrt
    o_ref[...] = (x * inv).astype(o_ref.dtype)


def _row_l2_normalize(x, out_dtype=_HALF):
    rows, cols = x.shape
    in_b = x.dtype.itemsize
    out_b = jnp.dtype(out_dtype).itemsize

    # Largest row-tile that fits the budget with double-buffered in/out streams.
    per_row = 2 * (in_b + out_b) * cols
    tile = max(8, (_VMEM_BUDGET // max(per_row, 1)) // 8 * 8)
    tile = min(tile, 2048, _round_up(rows, 8))
    padded = _round_up(rows, tile)
    if padded != rows:
        x = jnp.pad(x, ((0, padded - rows), (0, 0)))

    cost = pl.CostEstimate(
        flops=3 * padded * cols,
        transcendentals=padded,
        bytes_accessed=padded * cols * (in_b + out_b),
    )
    out = pl.pallas_call(
        _rownorm_kernel,
        out_shape=jax.ShapeDtypeStruct((padded, cols), out_dtype),
        grid_spec=pltpu.PrefetchScalarGridSpec(
            num_scalar_prefetch=0,
            grid=(padded // tile,),
            in_specs=[pl.BlockSpec((tile, cols), lambda i: (i, 0))],
            out_specs=pl.BlockSpec((tile, cols), lambda i: (i, 0)),
        ),
        compiler_params=pltpu.CompilerParams(
            dimension_semantics=("parallel",),
            vmem_limit_bytes=_VMEM_LIMIT,
        ),
        cost_estimate=cost,
    )(x)
    return out[:rows] if padded != rows else out


# --------------------------------------------------------------------------
# Kernel 2: blend + dim-0 L2-normalize (native [D, C] layout) -- clip_weights
# --------------------------------------------------------------------------
def _blend_dim0norm_kernel(cw_ref, res_t_ref, o_ref, *, beta):
    cw = cw_ref[...].astype(jnp.float32)        # (D, tc)
    rt = res_t_ref[...].astype(jnp.float32)     # (D, tc)
    x = (1.0 - beta) * cw + beta * rt
    inv = jax.lax.rsqrt(jnp.sum(x * x, axis=0, keepdims=True))    # per-column norm
    o_ref[...] = (x * inv).astype(o_ref.dtype)


def _blend_dim0_l2_normalize(clip_weights, res_t, beta, out_dtype=_HALF):
    D, C = clip_weights.shape
    cw_b = clip_weights.dtype.itemsize
    rt_b = res_t.dtype.itemsize
    out_b = jnp.dtype(out_dtype).itemsize

    # Column tile: full D per block (single-pass dim-0 reduction), tile over C.
    per_col = 2 * (cw_b + rt_b + out_b) * D
    max_cols = max(128, (_VMEM_BUDGET // max(per_col, 1)) // 128 * 128)
    max_cols = min(max_cols, 4096)

    if C <= max_cols:
        tc, padded = C, C                        # one block, full extents
    else:
        tc = max_cols
        padded = _round_up(C, tc)
        if padded != C:
            pad = padded - C
            clip_weights = jnp.pad(clip_weights, ((0, 0), (0, pad)))
            res_t = jnp.pad(res_t, ((0, 0), (0, pad)))

    cost = pl.CostEstimate(
        flops=7 * D * padded,
        transcendentals=padded,
        bytes_accessed=D * padded * (cw_b + rt_b + out_b),
    )
    out = pl.pallas_call(
        functools.partial(_blend_dim0norm_kernel, beta=float(beta)),
        out_shape=jax.ShapeDtypeStruct((D, padded), out_dtype),
        grid_spec=pltpu.PrefetchScalarGridSpec(
            num_scalar_prefetch=0,
            grid=(padded // tc,),
            in_specs=[pl.BlockSpec((D, tc), lambda i: (0, i)),
                      pl.BlockSpec((D, tc), lambda i: (0, i))],
            out_specs=pl.BlockSpec((D, tc), lambda i: (0, i)),
        ),
        compiler_params=pltpu.CompilerParams(
            dimension_semantics=("parallel",),
            vmem_limit_bytes=_VMEM_LIMIT,
        ),
        cost_estimate=cost,
    )(clip_weights, res_t)
    return out[:, :C] if padded != C else out


# --------------------------------------------------------------------------
# Forward
# --------------------------------------------------------------------------
def text_adapter_forward(cache_keys, clip_weights, cache_values, res, ratio_beta):
    """Pallas equivalent of TextAdapter.forward."""
    # 1) L2-normalize cache keys along the feature (last) dim.
    new_cache_keys = _row_l2_normalize(cache_keys)

    # 2) Blend clip_weights with res.T and normalize along dim 0, in native
    #    [feat_dim, cate_num] layout.  Only the small bf16 `res` param is
    #    transposed (wrapper-side); no transposes of the f32 matrix or output.
    res_t = res.T                                                   # [D, C]
    new_clip_weights = _blend_dim0_l2_normalize(clip_weights, res_t, ratio_beta)

    # 3) cache_values: pass-through + cast (trivial; left to XLA).
    new_cache_values = cache_values.astype(_HALF)

    return new_cache_keys, new_clip_weights, new_cache_values


# --------------------------------------------------------------------------
# Reference + test
# --------------------------------------------------------------------------
def _reference(cache_keys, clip_weights, cache_values, res, beta):
    res_text = res.astype(jnp.float32).T
    ncw = (1.0 - beta) * clip_weights.astype(jnp.float32) + beta * res_text
    ncw = ncw / jnp.linalg.norm(ncw, axis=0, keepdims=True)
    nck = cache_keys.astype(jnp.float32)
    nck = nck / jnp.linalg.norm(nck, axis=-1, keepdims=True)
    return nck.astype(_HALF), ncw.astype(_HALF), cache_values.astype(_HALF)


if __name__ == "__main__":
    key = jax.random.PRNGKey(0)
    k1, k2, k3, k4 = jax.random.split(key, 4)

    feat_dim, cate_num, n_cache = 32, 10, 20   # small synthetic shapes
    ratio_beta = 0.6

    clip_weights = jax.random.normal(k1, (feat_dim, cate_num), dtype=jnp.float32)
    cache_keys = jax.random.normal(k2, (n_cache, feat_dim), dtype=jnp.float32)
    cache_values = (jax.random.uniform(k3, (n_cache, cate_num)) > 0.5).astype(jnp.float32)
    # In the module `res` is a zero-initialized half parameter; use small
    # non-zero values here so the blend path is actually exercised.
    res = (0.1 * jax.random.normal(k4, (cate_num, feat_dim), dtype=jnp.float32)).astype(_HALF)

    fwd = jax.jit(functools.partial(text_adapter_forward, ratio_beta=ratio_beta))
    nck, ncw, ncv = fwd(cache_keys, clip_weights, cache_values, res)
    nck = jax.block_until_ready(nck)
    ncw = jax.block_until_ready(ncw)
    ncv = jax.block_until_ready(ncv)

    r_nck, r_ncw, r_ncv = _reference(cache_keys, clip_weights, cache_values, res, ratio_beta)

    assert nck.shape == (n_cache, feat_dim) and nck.dtype == _HALF
    assert ncw.shape == (feat_dim, cate_num) and ncw.dtype == _HALF
    assert ncv.shape == (n_cache, cate_num) and ncv.dtype == _HALF
    assert jnp.allclose(nck.astype(jnp.float32), r_nck.astype(jnp.float32), rtol=2e-2, atol=2e-2)
    assert jnp.allclose(ncw.astype(jnp.float32), r_ncw.astype(jnp.float32), rtol=2e-2, atol=2e-2)
    assert jnp.allclose(ncv.astype(jnp.float32), r_ncv.astype(jnp.float32), rtol=2e-2, atol=2e-2)

    print("KERNEL_OK")
</pallas_src>

<mosaic_0001>
module attributes {stable_mosaic.version = 11 : i64} {
  func.func @_blend_dim0norm_kernel(%arg0: i32, %arg1: memref<32x10xf32, #tpu.memory_space<vmem>>, %arg2: memref<32x10xbf16, #tpu.memory_space<vmem>>, %arg3: memref<32x10xbf16, #tpu.memory_space<vmem>>) attributes {dimension_semantics = [#tpu.dimension_semantics<parallel>], iteration_bounds = array<i64: 1>, scalar_prefetch = 0 : i64, scratch_operands = 0 : i64, tpu.core_type = #tpu.core_type<tc>, window_params = [{transform_indices = @transform_0, window_bounds = array<i64: 32, 10>}, {transform_indices = @transform_1, window_bounds = array<i64: 32, 10>}, {transform_indices = @transform_2, window_bounds = array<i64: 32, 10>}]} {
    %c0 = arith.constant 0 : index
    %c0_0 = arith.constant 0 : index
    %0 = vector.load %arg1[%c0, %c0_0] : memref<32x10xf32, #tpu.memory_space<vmem>>, vector<32x10xf32>
    %c0_1 = arith.constant 0 : index
    %c0_2 = arith.constant 0 : index
    %1 = vector.load %arg2[%c0_1, %c0_2] : memref<32x10xbf16, #tpu.memory_space<vmem>>, vector<32x10xbf16>
    %2 = arith.extf %1 : vector<32x10xbf16> to vector<32x10xf32>
    %cst = arith.constant 4.000000e-01 : f32
    %3 = vector.broadcast %cst : f32 to vector<32x10xf32>
    %4 = arith.mulf %3, %0 : vector<32x10xf32>
    %cst_3 = arith.constant 6.000000e-01 : f32
    %5 = vector.broadcast %cst_3 : f32 to vector<32x10xf32>
    %6 = arith.mulf %5, %2 : vector<32x10xf32>
    %7 = arith.addf %4, %6 : vector<32x10xf32>
    %8 = arith.mulf %7, %7 : vector<32x10xf32>
    %cst_4 = arith.constant dense<0.000000e+00> : vector<10xf32>
    %9 = vector.multi_reduction <add>, %8, %cst_4 [0] : vector<32x10xf32> to vector<10xf32>
    %10 = vector.shape_cast %9 : vector<10xf32> to vector<1x10xf32>
    %11 = math.rsqrt %10 : vector<1x10xf32>
    %12 = vector.broadcast %11 : vector<1x10xf32> to vector<32x10xf32>
    %13 = arith.mulf %7, %12 : vector<32x10xf32>
    %14 = arith.truncf %13 : vector<32x10xf32> to vector<32x10xbf16>
    %c0_5 = arith.constant 0 : index
    %c0_6 = arith.constant 0 : index
    %15 = vector.load %arg3[%c0_5, %c0_6] : memref<32x10xbf16, #tpu.memory_space<vmem>>, vector<32x10xbf16>
    tpu.vector_store %arg3[%c0_5, %c0_6], %14 {strides = array<i32>} : memref<32x10xbf16, #tpu.memory_space<vmem>>, vector<32x10xbf16>,
    return
  }
  func.func @transform_0(%arg0: i32) -> (i32, i32) {
    %c0_i32 = arith.constant 0 : i32
    %c0_i32_0 = arith.constant 0 : i32
    return %c0_i32, %arg0 : i32, i32
  }
  func.func @transform_1(%arg0: i32) -> (i32, i32) {
    %c0_i32 = arith.constant 0 : i32
    %c0_i32_0 = arith.constant 0 : i32
    return %c0_i32, %arg0 : i32, i32
  }
  func.func @transform_2(%arg0: i32) -> (i32, i32) {
    %c0_i32 = arith.constant 0 : i32
    %c0_i32_0 = arith.constant 0 : i32
    return %c0_i32, %arg0 : i32, i32
  }
}

module attributes {stable_mosaic.version = 11 : i64} {
  func.func @_rownorm_kernel(%arg0: i32, %arg1: memref<24x32xf32, #tpu.memory_space<vmem>>, %arg2: memref<24x32xbf16, #tpu.memory_space<vmem>>) attributes {dimension_semantics = [#tpu.dimension_semantics<parallel>], iteration_bounds = array<i64: 1>, scalar_prefetch = 0 : i64, scratch_operands = 0 : i64, tpu.core_type = #tpu.core_type<tc>, window_params = [{transform_indices = @transform_0, window_bounds = array<i64: 24, 32>}, {transform_indices = @transform_1, window_bounds = array<i64: 24, 32>}]} {
    %c0 = arith.constant 0 : index
    %c0_0 = arith.constant 0 : index
    %0 = vector.load %arg1[%c0, %c0_0] : memref<24x32xf32, #tpu.memory_space<vmem>>, vector<24x32xf32>
    %1 = arith.mulf %0, %0 : vector<24x32xf32>
    %cst = arith.constant dense<0.000000e+00> : vector<24xf32>
    %2 = vector.multi_reduction <add>, %1, %cst [1] : vector<24x32xf32> to vector<24xf32>
    %3 = vector.shape_cast %2 : vector<24xf32> to vector<24x1xf32>
    %4 = math.rsqrt %3 : vector<24x1xf32>
    %5 = vector.broadcast %4 : vector<24x1xf32> to vector<24x32xf32>
    %6 = arith.mulf %0, %5 : vector<24x32xf32>
    %7 = arith.truncf %6 : vector<24x32xf32> to vector<24x32xbf16>
    %c0_1 = arith.constant 0 : index
    %c0_2 = arith.constant 0 : index
    %8 = vector.load %arg2[%c0_1, %c0_2] : memref<24x32xbf16, #tpu.memory_space<vmem>>, vector<24x32xbf16>
    tpu.vector_store %arg2[%c0_1, %c0_2], %7 {strides = array<i32>} : memref<24x32xbf16, #tpu.memory_space<vmem>>, vector<24x32xbf16>,
    return
  }
  func.func @transform_0(%arg0: i32) -> (i32, i32) {
    %c0_i32 = arith.constant 0 : i32
    %c0_i32_0 = arith.constant 0 : i32
    return %arg0, %c0_i32 : i32, i32
  }
  func.func @transform_1(%arg0: i32) -> (i32, i32) {
    %c0_i32 = arith.constant 0 : i32
    %c0_i32_0 = arith.constant 0 : i32
    return %arg0, %c0_i32 : i32, i32
  }
}

</mosaic_0001>

<bundles_post_ra>
// kernel: text_adapter_forward.3
= control target key start
LH: loop header
LB: loop body
LE: loop exit
PB: predicated region body
PF: predicated region fallthrough
CT: control target
= control target key end

     0   :  { %vm39_vm0 = vcmask 80896   ;;  %vm74_vm1 = vcmask 76800   ;;  %s147_s0 = inlined_call_operand.vmem [shape: f32[32,10], index: 0, kind: input, shape index: {}]   ;;  %s148_s1 = inlined_call_operand.vmem [shape: bf16[32,10], index: 1, kind: input, shape index: {}]   ;;  %s149_s2 = inlined_call_operand.vmem [shape: bf16[32,10], index: 2, kind: output, shape index: {}]  }
   0x1   :  { %v11_v0 = vld [vmem:[%s147_s0] sm:$0xff]  ;;  %v12_v1 = vld [vmem:[%s147_s0 + $0x8] sm:$0xff]  ;;  %v13_v2 = vld [vmem:[%s147_s0 + $0x10] sm:$0xff] }
   0x2   :  { %v14_v3 = vld [vmem:[%s147_s0 + $0x18] sm:$0xff]  ;;  %v92_v4 = vld [vmem:[%s148_s1] sm:$0xff]   ;;  %v99_v5 = vld [vmem:[%s148_s1 + $0x8] sm:$0xff]   ;;  %v23_v6 = vmul.f32 0.4, %v11_v0 }
   0x3   :  { %v93_v7 = vunpack.c.l.bf16 %v92_v4  ;;  %v94_v8 = vunpack.c.h.bf16 %v92_v4  ;;  %v97_v9 = vunpack.c.l.bf16 %v99_v5  ;;  %v98_v10 = vunpack.c.h.bf16 %v99_v5 }
   0x4   :  { %v24_v11 = vmul.f32 0.4, %v12_v1  ;;  %v25_v12 = vmul.f32 0.4, %v13_v2  ;;  %v26_v13 = vmul.f32 0.4, %v14_v3 }
   0x5   :  { %v27_v14 = vmul.f32 0.6, %v93_v7  ;;  %v28_v15 = vmul.f32 0.6, %v94_v8  ;;  %v29_v16 = vmul.f32 0.6, %v97_v9 }
   0x6   :  { %v30_v17 = vmul.f32 0.6, %v98_v10 }
   0x7   :  { %v31_v18 = vadd.f32 %v27_v14, %v23_v6  ;;  %v32_v19 = vadd.f32 %v28_v15, %v24_v11  ;;  %v33_v20 = vadd.f32 %v29_v16, %v25_v12 }
   0x8   :  { %v34_v21 = vadd.f32 %v30_v17, %v26_v13 }
   0x9   :  { %v35_v22 = vmul.f32 %v31_v18, %v31_v18  ;;  %v36_v23 = vmul.f32 %v32_v19, %v32_v19  ;;  %v37_v24 = vmul.f32 %v33_v20, %v33_v20 }
   0xa   :  { %v38_v25 = vmul.f32 %v34_v21, %v34_v21 }
   0xb   :  { %v40_v26 = vsel %vm39_vm0, %v35_v22, 0.0  ;;  %v41_v27 = vsel %vm39_vm0, %v36_v23, 0.0  ;;  %v43_v28 = vsel %vm39_vm0, %v37_v24, 0.0 }
   0xc   :  { %v42_v29 = vadd.f32 %v41_v27, %v40_v26  ;;  %v45_v30 = vsel %vm39_vm0, %v38_v25, 0.0 }
   0xe   :  { %v44_v31 = vadd.f32 %v43_v28, %v42_v29 }
  0x10   :  { %v46_v32 = vadd.f32 %v45_v30, %v44_v31 }
  0x12   :  { %v47_v33 = vrot.slane %v46_v32, 4 }
  0x14   :  { %v48_v34 = vadd.f32 %v47_v33, %v46_v32 }
  0x16   :  { %v49_v35 = vrot.slane %v48_v34, 2 }
  0x18   :  { %v50_v36 = vadd.f32 %v49_v35, %v48_v34 }
  0x1a   :  { %v51_v37 = vrot.slane %v50_v36, 1 }
  0x1c   :  { %v52_v38 = vadd.f32 %v51_v37, %v50_v36 }
  0x1e   :  { %100 = vrsqrt.f32 %v52_v38 }
  0x28   :  { %v101_v39 = vpop.eup %100 }
  0x29   :  { %v54_v40 = vmul.f32 %v101_v39, %v31_v18  ;;  %v55_v41 = vmul.f32 %v101_v39, %v32_v19  ;;  %v56_v42 = vmul.f32 %v101_v39, %v33_v20  ;;  %v57_v43 = vmul.f32 %v101_v39, %v34_v21 }
  0x2b   :  { %v87_v44 = vpack.c.bf16 %v54_v40, %v54_v40  ;;  %v88_v45 = vpack.c.bf16 %v55_v41, %v55_v41  ;;  %v89_v46 = vpack.c.bf16 %v56_v42, %v56_v42  ;;  %v90_v47 = vpack.c.bf16 %v57_v43, %v57_v43 }
  0x2d   :  { %75 = vst.msk [vmem:[%s149_s2] sm:$0xf] %vm74_vm1, %v87_v44  ;;  %76 = vst.msk [vmem:[%s149_s2 + $0x4] sm:$0xf] %vm74_vm1, %v88_v45 }
  0x2e   :  { %77 = vst.msk [vmem:[%s149_s2 + $0x8] sm:$0xf] %vm74_vm1, %v89_v46  ;;  %78 = vst.msk [vmem:[%s149_s2 + $0xc] sm:$0xf] %vm74_vm1, %v90_v47 }

// kernel: text_adapter_forward.2
= control target key start
LH: loop header
LB: loop body
LE: loop exit
PB: predicated region body
PF: predicated region fallthrough
CT: control target
= control target key end

     0   :  { %vm15_vm0 = vcmask 261120   ;;  %s137_s0 = inlined_call_operand.vmem [shape: f32[24,32], index: 0, kind: input, shape index: {}]   ;;  %s138_s1 = inlined_call_operand.hbm [shape: bf16[24,32], index: 1, kind: output, shape index: {}]  }
   0x1   :  { %v9_v0 = vld [vmem:[%s137_s0] sm:$0xff]  ;;  %v11_v1 = vld [vmem:[%s137_s0 + $0x10] sm:$0xff]  ;;  %v10_v2 = vld [vmem:[%s137_s0 + $0x8] sm:$0xff] }
   0x2   :  { %v12_v3 = vmul.f32 %v9_v0, %v9_v0  ;;  %v14_v4 = vmul.f32 %v11_v1, %v11_v1  ;;  %v13_v5 = vmul.f32 %v10_v2, %v10_v2 }
   0x3   :  { %6 = vsyncpa [#allocation3], 0  ;;  %vm44_vm1 = vcmask 257024   ;;  %s103_s0 = smov [#allocation2]  }
   0x4   :  { %v16_v6 = vsel %vm15_vm0, %v12_v3, 0.0  ;;  %v22_v7 = vsel %vm15_vm0, %v14_v4, 0.0  ;;  %v19_v8 = vsel %vm15_vm0, %v13_v5, 0.0  ;;  %s53_s12 = sshll.u32 %s103_s0, 4  ;;  %s54_s12 = int_to_ptr.vmem [resolvable:$true] %s53_s12 }
   0x5   :  { %17 = vadd.xlane.f32.xlu0 %v16_v6  ;;  %23 = vadd.xlane.f32.xlu1 %v22_v7  ;;  %s79_s13 = scalar_lea.vmem %s54_s12, 192  ;;  %p84_p1 = scmp.lt.s32.totalorder %s54_s12, %s54_s12 }
   0x6   :  { %p80_p0 = scmp.ne.s32.totalorder %s54_s12, %s79_s13  ;;  %p85_p2 = scmp.lt.s32.totalorder %s79_s13, %s79_s13 }
   0x8   :  { %p86_p3 = por %p85_p2, %p84_p1 }
   0x9   :  { %20 = vadd.xlane.f32.xlu0 %v19_v8 }
   0xa   :  { %p87_p4 = pnand %p86_p3, %p80_p0 }
  0x92   :  { %v18_v9 = vpop.xlane.xlu0 %17  ;;  %v24_v10 = vpop.xlane.xlu1 %23 }
  0x93   :  { %73 = vrsqrt.f32 %v18_v9 }
  0x94   :  { %75 = vrsqrt.f32 %v24_v10 }
  0x96   :  { %v21_v11 = vpop.xlane.xlu0 %20 }
  0x97   :  { %77 = vrsqrt.f32 %v21_v11 }
  0x9d   :  { %v74_v12 = vpop.eup %73 }
  0x9e   :  { %v76_v13 = vpop.eup %75  ;;  %v28_v14 = vmul.f32 %v74_v12, %v9_v0 }
  0x9f   :  { %v30_v15 = vmul.f32 %v76_v13, %v11_v1 }
  0xa0   :  { %v67_v16 = vpack.c.bf16 %v28_v14, %v28_v14 }
  0xa1   :  { %v78_v17 = vpop.eup %77  ;;  %v69_v18 = vpack.c.bf16 %v30_v15, %v30_v15 }
  0xa2   :  { %v29_v19 = vmul.f32 %v78_v17, %v10_v2  ;;  %45 = vst.msk [vmem:[#allocation2] sm:$0xf] %vm44_vm1, %v67_v16 }
  0xa3   :  { %47 = vst.msk [vmem:[#allocation2 + $0x8] sm:$0xf] %vm44_vm1, %v69_v18 }
  0xa4   :  { %v68_v20 = vpack.c.bf16 %v29_v19, %v29_v19 }
  0xa6   :  { %46 = vst.msk [vmem:[#allocation2 + $0x4] sm:$0xf] %vm44_vm1, %v68_v20 }
  0xa7   :  { %90 = shalt.err (!%p87_p4)
}
  0xa8   :  { %s91_s16 = scalar_lea.hbm %s138_s1, 192 }
  0xa9   :  { %p92_p5 = scmp.ne.s32.totalorder %s138_s1, %s91_s16  ;;  %p95_p6 = scmp.lt.u32.totalorder %s91_s16, %s138_s1 }
  0xab   :  { %p97_p7 = pnand %p95_p6, %p92_p5 }
  0xad   :  { %100 = shalt.err (!%p97_p7)
}
  0xae   :  { %s104_s21 = smov 64   ;;  %s105_s22 = smov 4  }
  0xaf   :  { %59 = dma.vmem_to_hbm [thread:$0]  %s54_s12, 192, %s138_s1, [#allocation3], %s104_s21, %s104_s21, %s105_s22  }
  0xb0   :  { %101 = dma.done.wait [#allocation3], 192  }
  0xb1   :  { %102 = vsyncadd [#allocation3], 4294967104 }
  0xb2   :  { %63 = vsyncpa [#allocation3], 1 }

</bundles_post_ra>
